<compile_context>
chip_gen: v7x
topology: tpu7x:2x2x1
jax: 0.10.0
libtpu: 0.0.40
codegen_flags: <defaults>
</compile_context>

<pallas_src>
from functools import partial

import jax
import jax.numpy as jnp
from jax import lax
from jax.experimental import pallas as pl
from jax.experimental.pallas import tpu as pltpu


def _sparse_attn_kernel(x_ref, wq_ref, wk_ref, wv_ref, wo_ref, bo_ref,
                        o_ref, acc_ref, *, scale, k_top):
    # x_ref:  (1, n, dim)      wq/wk/wv_ref: (1, dim, d)   wo_ref: (1, d, dim)
    # bo_ref: (1, dim)         o_ref: (1, n, dim)          acc_ref: (n, dim) f32
    hid = pl.program_id(1)

    @pl.when(hid == 0)
    def _init():
        acc_ref[...] = jnp.zeros_like(acc_ref)

    x = x_ref[0]                                                        # (n, dim)
    q = jnp.dot(x, wq_ref[0], preferred_element_type=jnp.float32)       # (n, d)
    k = jnp.dot(x, wk_ref[0], preferred_element_type=jnp.float32)       # (n, d)
    v = jnp.dot(x, wv_ref[0], preferred_element_type=jnp.float32)       # (n, d)

    # scores: q @ k^T, scaled by dim ** -0.5 (note: model dim, per the module)
    dots = lax.dot_general(q, k, (((1,), (1,)), ((), ())),
                           preferred_element_type=jnp.float32) * scale  # (n, n)

    # --- top-k threshold per query row (duplicates counted, like torch.topk) --
    # kth = value of the k_top-th largest score in the row; an element is kept
    # iff dots >= kth (ties kept), matching `dots >= topk[..., -1:]` in torch.
    neg_big = jnp.float32(jnp.finfo(jnp.float32).min)   # == -finfo(f32).max
    n_rows = dots.shape[0]
    kth = jnp.full((n_rows, 1), jnp.finfo(jnp.float32).max, dtype=jnp.float32)
    cum = jnp.zeros((n_rows, 1), dtype=jnp.float32)
    for _ in range(k_top):                     # k_top is small & static -> unrolled
        below = jnp.where(dots < kth, dots, neg_big)           # values still below kth
        cur = jnp.max(below, axis=-1, keepdims=True)           # next distinct level
        cnt = jnp.sum((dots == cur).astype(jnp.float32), axis=-1, keepdims=True)
        need = cum < k_top                                     # still short of k values?
        kth = jnp.where(need, cur, kth)
        cum = jnp.where(need, cum + cnt, cum)

    sdots = jnp.where(dots >= kth, dots, neg_big)

    # --- softmax over keys ----------------------------------------------------
    m = jnp.max(sdots, axis=-1, keepdims=True)
    e = jnp.exp(sdots - m)
    attn = e / jnp.sum(e, axis=-1, keepdims=True)

    # --- relu(V), weighted sum, and this head's output-projection slice -------
    out_h = jnp.dot(attn, jnp.maximum(v, 0.0),
                    preferred_element_type=jnp.float32)                  # (n, d)
    acc_ref[...] += jnp.dot(out_h, wo_ref[0],
                            preferred_element_type=jnp.float32)          # (n, dim)

    @pl.when(hid == pl.num_programs(1) - 1)
    def _finalize():
        o_ref[0] = acc_ref[...] + bo_ref[...]


def sparse_attention_forward(x, w_qkv, w_o, b_o, *, heads, sparsity):
    """x: (b, n, dim) f32; w_qkv: (3*inner, dim); w_o: (dim, inner); b_o: (dim,)."""
    b, n, dim = x.shape
    inner = w_qkv.shape[0] // 3
    d = inner // heads
    scale = float(dim) ** -0.5
    k_top = max(1, int(sparsity * n)) if sparsity < 1.0 else n

    # Per-head weight slabs laid out so every in-kernel matmul is a plain (M,K)@(K,N).
    wq = w_qkv[0 * inner:1 * inner].reshape(heads, d, dim).transpose(0, 2, 1)  # (h, dim, d)
    wk = w_qkv[1 * inner:2 * inner].reshape(heads, d, dim).transpose(0, 2, 1)  # (h, dim, d)
    wv = w_qkv[2 * inner:3 * inner].reshape(heads, d, dim).transpose(0, 2, 1)  # (h, dim, d)
    wo = w_o.T.reshape(heads, d, dim)                                          # (h, d, dim)
    bo = b_o.reshape(1, dim)

    kernel = partial(_sparse_attn_kernel, scale=scale, k_top=k_top)
    head_map = lambda bi, hi: (hi, 0, 0)
    return pl.pallas_call(
        kernel,
        out_shape=jax.ShapeDtypeStruct((b, n, dim), jnp.float32),
        grid_spec=pltpu.PrefetchScalarGridSpec(
            num_scalar_prefetch=0,
            grid=(b, heads),                     # heads last: it is the reduction axis
            in_specs=[
                pl.BlockSpec((1, n, dim), lambda bi, hi: (bi, 0, 0)),
                pl.BlockSpec((1, dim, d), head_map),
                pl.BlockSpec((1, dim, d), head_map),
                pl.BlockSpec((1, dim, d), head_map),
                pl.BlockSpec((1, d, dim), head_map),
                pl.BlockSpec((1, dim), lambda bi, hi: (0, 0)),
            ],
            out_specs=pl.BlockSpec((1, n, dim), lambda bi, hi: (bi, 0, 0)),
            scratch_shapes=[pltpu.VMEM((n, dim), jnp.float32)],
        ),
        compiler_params=pltpu.CompilerParams(
            dimension_semantics=("parallel", "arbitrary"),
        ),
    )(x.astype(jnp.float32), wq, wk, wv, wo, bo)


def _reference_forward(x, w_qkv, w_o, b_o, *, heads, sparsity):
    """Plain-JAX replica of the PyTorch forward (mask=None, eval-mode dropout)."""
    b, n, dim = x.shape
    inner = w_qkv.shape[0] // 3
    d = inner // heads
    hp = lax.Precision.HIGHEST
    qkv = jnp.einsum("bnd,ed->bne", x, w_qkv, precision=hp)      # to_qkv (no bias)
    q, k, v = jnp.split(qkv, 3, axis=-1)
    split = lambda t: t.reshape(b, n, heads, d).transpose(0, 2, 1, 3)
    q, k, v = split(q), split(k), split(v)
    dots = jnp.einsum("bhid,bhjd->bhij", q, k, precision=hp) * (float(dim) ** -0.5)
    neg_big = jnp.finfo(jnp.float32).min
    if sparsity < 1.0:
        k_top = max(1, int(sparsity * dots.shape[-1]))
        thr = lax.top_k(dots, k_top)[0][..., -1:]
        dots = jnp.where(dots >= thr, dots, neg_big)
    attn = jax.nn.softmax(dots, axis=-1)
    out = jnp.einsum("bhij,bhjd->bhid", attn, jnp.maximum(v, 0.0), precision=hp)
    out = out.transpose(0, 2, 1, 3).reshape(b, n, inner)
    return jnp.einsum("bni,oi->bno", out, w_o, precision=hp) + b_o


if __name__ == "__main__":
    batch, seq, dim = 2, 32, 128
    heads, dim_head, sparsity = 4, 32, 0.1           # k_top = 3
    inner = heads * dim_head

    key = jax.random.PRNGKey(0)
    kx, kq, ko, kb = jax.random.split(key, 4)
    # Test inputs are drawn from a small power-of-two grid so the QK^T logits
    # are exactly representable under every TPU matmul precision mode (MXU
    # bf16 passes vs XLA f32 emulation).  That makes the *discrete* top-k mask
    # bit-identical between kernel and reference, so the comparison checks the
    # kernel logic rather than tie-breaking noise; the continuous parts
    # (softmax, relu, projections) are covered by the tolerance.
    x = jax.random.randint(kx, (batch, seq, dim), -1, 2).astype(jnp.float32)
    w_qkv = jax.random.randint(kq, (3 * inner, dim), -1, 2).astype(jnp.float32) / 16.0
    w_o = jax.random.randint(ko, (dim, inner), -1, 2).astype(jnp.float32) / 16.0
    b_o = jax.random.randint(kb, (dim,), -1, 2).astype(jnp.float32) / 16.0

    out = sparse_attention_forward(x, w_qkv, w_o, b_o, heads=heads, sparsity=sparsity)
    out = jax.block_until_ready(out)

    ref = _reference_forward(x, w_qkv, w_o, b_o, heads=heads, sparsity=sparsity)
    assert out.shape == ref.shape == (batch, seq, dim), out.shape
    max_err = float(jnp.max(jnp.abs(out - ref)))
    assert jnp.allclose(out, ref, rtol=2e-2, atol=2e-2), max_err

    print("KERNEL_OK")
</pallas_src>

<mosaic_0001>
module attributes {stable_mosaic.version = 11 : i64} {
  func.func @_sparse_attn_kernel(%arg0: i32, %arg1: i32, %arg2: memref<1x32x128xf32, #tpu.memory_space<vmem>>, %arg3: memref<1x128x32xf32, #tpu.memory_space<vmem>>, %arg4: memref<1x128x32xf32, #tpu.memory_space<vmem>>, %arg5: memref<1x128x32xf32, #tpu.memory_space<vmem>>, %arg6: memref<1x32x128xf32, #tpu.memory_space<vmem>>, %arg7: memref<1x128xf32, #tpu.memory_space<vmem>>, %arg8: memref<1x32x128xf32, #tpu.memory_space<vmem>>, %arg9: memref<32x128xf32, #tpu.memory_space<vmem>>) attributes {dimension_semantics = [#tpu.dimension_semantics<parallel>, #tpu.dimension_semantics<arbitrary>], iteration_bounds = array<i64: 2, 4>, scalar_prefetch = 0 : i64, scratch_operands = 1 : i64, tpu.core_type = #tpu.core_type<tc>, window_params = [{transform_indices = @transform_0, window_bounds = array<i64: 1, 32, 128>}, {transform_indices = @transform_1, window_bounds = array<i64: 1, 128, 32>}, {transform_indices = @transform_2, window_bounds = array<i64: 1, 128, 32>}, {transform_indices = @transform_3, window_bounds = array<i64: 1, 128, 32>}, {transform_indices = @transform_4, window_bounds = array<i64: 1, 32, 128>}, {pipeline_mode = #tpu.pipeline_mode<synchronous>, transform_indices = @transform_5, window_bounds = array<i64: 1, 128>}, {transform_indices = @transform_6, window_bounds = array<i64: 1, 32, 128>}]} {
    %c0_i32 = arith.constant 0 : i32
    %0 = arith.cmpi eq, %arg1, %c0_i32 : i32
    %1 = arith.extui %0 : i1 to i32
    %c0_i32_0 = arith.constant 0 : i32
    %2 = arith.cmpi ne, %1, %c0_i32_0 : i32
    scf.if %2 {
      %cst_43 = arith.constant 0.000000e+00 : f32
      %87 = vector.broadcast %cst_43 : f32 to vector<32x128xf32>
      %c0_44 = arith.constant 0 : index
      %c0_45 = arith.constant 0 : index
      %88 = vector.load %arg9[%c0_44, %c0_45] : memref<32x128xf32, #tpu.memory_space<vmem>>, vector<32x128xf32>
      tpu.vector_store %arg9[%c0_44, %c0_45], %87 {strides = array<i32>} : memref<32x128xf32, #tpu.memory_space<vmem>>, vector<32x128xf32>,
    } else {
    }
    %c0 = arith.constant 0 : index
    %c0_1 = arith.constant 0 : index
    %c0_2 = arith.constant 0 : index
    %3 = vector.load %arg2[%c0, %c0_1, %c0_2] : memref<1x32x128xf32, #tpu.memory_space<vmem>>, vector<1x32x128xf32>
    %4 = vector.shape_cast %3 : vector<1x32x128xf32> to vector<32x128xf32>
    %c0_3 = arith.constant 0 : index
    %c0_4 = arith.constant 0 : index
    %c0_5 = arith.constant 0 : index
    %5 = vector.load %arg3[%c0_3, %c0_4, %c0_5] : memref<1x128x32xf32, #tpu.memory_space<vmem>>, vector<1x128x32xf32>
    %6 = vector.shape_cast %5 : vector<1x128x32xf32> to vector<128x32xf32>
    %cst = arith.constant dense<0.000000e+00> : vector<32x32xf32>
    %7 = tpu.matmul %4, %6, %cst {dimension_numbers = #tpu.dot_dimension_numbers<[1], [0], [0], [1], [0, 0, 1, 1], [], []>} : vector<32x128xf32>, vector<128x32xf32>, vector<32x32xf32> -> vector<32x32xf32>
    %c0_6 = arith.constant 0 : index
    %c0_7 = arith.constant 0 : index
    %c0_8 = arith.constant 0 : index
    %8 = vector.load %arg4[%c0_6, %c0_7, %c0_8] : memref<1x128x32xf32, #tpu.memory_space<vmem>>, vector<1x128x32xf32>
    %9 = vector.shape_cast %8 : vector<1x128x32xf32> to vector<128x32xf32>
    %cst_9 = arith.constant dense<0.000000e+00> : vector<32x32xf32>
    %10 = tpu.matmul %4, %9, %cst_9 {dimension_numbers = #tpu.dot_dimension_numbers<[1], [0], [0], [1], [0, 0, 1, 1], [], []>} : vector<32x128xf32>, vector<128x32xf32>, vector<32x32xf32> -> vector<32x32xf32>
    %c0_10 = arith.constant 0 : index
    %c0_11 = arith.constant 0 : index
    %c0_12 = arith.constant 0 : index
    %11 = vector.load %arg5[%c0_10, %c0_11, %c0_12] : memref<1x128x32xf32, #tpu.memory_space<vmem>>, vector<1x128x32xf32>
    %12 = vector.shape_cast %11 : vector<1x128x32xf32> to vector<128x32xf32>
    %cst_13 = arith.constant dense<0.000000e+00> : vector<32x32xf32>
    %13 = tpu.matmul %4, %12, %cst_13 {dimension_numbers = #tpu.dot_dimension_numbers<[1], [0], [0], [1], [0, 0, 1, 1], [], []>} : vector<32x128xf32>, vector<128x32xf32>, vector<32x32xf32> -> vector<32x32xf32>
    %cst_14 = arith.constant dense<0.000000e+00> : vector<32x32xf32>
    %14 = tpu.matmul %7, %10, %cst_14 {dimension_numbers = #tpu.dot_dimension_numbers<[1], [1], [0], [0], [0, 0, 1, 0], [], []>} : vector<32x32xf32>, vector<32x32xf32>, vector<32x32xf32> -> vector<32x32xf32>
    %cst_15 = arith.constant 0.0883883461 : f32
    %15 = vector.broadcast %cst_15 : f32 to vector<32x32xf32>
    %16 = arith.mulf %14, %15 : vector<32x32xf32>
    %cst_16 = arith.constant 3.40282347E+38 : f32
    %17 = vector.broadcast %cst_16 : f32 to vector<32x1xf32>
    %cst_17 = arith.constant 0.000000e+00 : f32
    %18 = vector.broadcast %cst_17 : f32 to vector<32x1xf32>
    %19 = vector.broadcast %17 : vector<32x1xf32> to vector<32x32xf32>
    %20 = arith.cmpf olt, %16, %19 : vector<32x32xf32>
    %cst_18 = arith.constant -3.40282347E+38 : f32
    %21 = vector.broadcast %cst_18 : f32 to vector<32x32xf32>
    %22 = arith.select %20, %16, %21 : vector<32x32xi1>, vector<32x32xf32>
    %cst_19 = arith.constant dense<0xFF800000> : vector<32xf32>
    %23 = vector.multi_reduction <maximumf>, %22, %cst_19 [1] : vector<32x32xf32> to vector<32xf32>
    %24 = vector.shape_cast %23 : vector<32xf32> to vector<32x1xf32>
    %25 = vector.broadcast %24 : vector<32x1xf32> to vector<32x32xf32>
    %26 = arith.cmpf oeq, %16, %25 : vector<32x32xf32>
    %27 = arith.extui %26 : vector<32x32xi1> to vector<32x32xi32>
    %28 = arith.sitofp %27 : vector<32x32xi32> to vector<32x32xf32>
    %cst_20 = arith.constant dense<0.000000e+00> : vector<32xf32>
    %29 = vector.multi_reduction <add>, %28, %cst_20 [1] : vector<32x32xf32> to vector<32xf32>
    %30 = vector.shape_cast %29 : vector<32xf32> to vector<32x1xf32>
    %cst_21 = arith.constant 3.000000e+00 : f32
    %31 = vector.broadcast %cst_21 : f32 to vector<32x1xf32>
    %32 = arith.cmpf olt, %18, %31 : vector<32x1xf32>
    %33 = arith.select %32, %24, %17 : vector<32x1xi1>, vector<32x1xf32>
    %34 = arith.addf %18, %30 : vector<32x1xf32>
    %35 = arith.select %32, %34, %18 : vector<32x1xi1>, vector<32x1xf32>
    %36 = vector.broadcast %33 : vector<32x1xf32> to vector<32x32xf32>
    %37 = arith.cmpf olt, %16, %36 : vector<32x32xf32>
    %cst_22 = arith.constant -3.40282347E+38 : f32
    %38 = vector.broadcast %cst_22 : f32 to vector<32x32xf32>
    %39 = arith.select %37, %16, %38 : vector<32x32xi1>, vector<32x32xf32>
    %cst_23 = arith.constant dense<0xFF800000> : vector<32xf32>
    %40 = vector.multi_reduction <maximumf>, %39, %cst_23 [1] : vector<32x32xf32> to vector<32xf32>
    %41 = vector.shape_cast %40 : vector<32xf32> to vector<32x1xf32>
    %42 = vector.broadcast %41 : vector<32x1xf32> to vector<32x32xf32>
    %43 = arith.cmpf oeq, %16, %42 : vector<32x32xf32>
    %44 = arith.extui %43 : vector<32x32xi1> to vector<32x32xi32>
    %45 = arith.sitofp %44 : vector<32x32xi32> to vector<32x32xf32>
    %cst_24 = arith.constant dense<0.000000e+00> : vector<32xf32>
    %46 = vector.multi_reduction <add>, %45, %cst_24 [1] : vector<32x32xf32> to vector<32xf32>
    %47 = vector.shape_cast %46 : vector<32xf32> to vector<32x1xf32>
    %cst_25 = arith.constant 3.000000e+00 : f32
    %48 = vector.broadcast %cst_25 : f32 to vector<32x1xf32>
    %49 = arith.cmpf olt, %35, %48 : vector<32x1xf32>
    %50 = arith.select %49, %41, %33 : vector<32x1xi1>, vector<32x1xf32>
    %51 = arith.addf %35, %47 : vector<32x1xf32>
    %52 = arith.select %49, %51, %35 : vector<32x1xi1>, vector<32x1xf32>
    %53 = vector.broadcast %50 : vector<32x1xf32> to vector<32x32xf32>
    %54 = arith.cmpf olt, %16, %53 : vector<32x32xf32>
    %cst_26 = arith.constant -3.40282347E+38 : f32
    %55 = vector.broadcast %cst_26 : f32 to vector<32x32xf32>
    %56 = arith.select %54, %16, %55 : vector<32x32xi1>, vector<32x32xf32>
    %cst_27 = arith.constant dense<0xFF800000> : vector<32xf32>
    %57 = vector.multi_reduction <maximumf>, %56, %cst_27 [1] : vector<32x32xf32> to vector<32xf32>
    %58 = vector.shape_cast %57 : vector<32xf32> to vector<32x1xf32>
    %cst_28 = arith.constant 3.000000e+00 : f32
    %59 = vector.broadcast %cst_28 : f32 to vector<32x1xf32>
    %60 = arith.cmpf olt, %52, %59 : vector<32x1xf32>
    %61 = arith.select %60, %58, %50 : vector<32x1xi1>, vector<32x1xf32>
    %62 = vector.broadcast %61 : vector<32x1xf32> to vector<32x32xf32>
    %63 = arith.cmpf oge, %16, %62 : vector<32x32xf32>
    %cst_29 = arith.constant -3.40282347E+38 : f32
    %64 = vector.broadcast %cst_29 : f32 to vector<32x32xf32>
    %65 = arith.select %63, %16, %64 : vector<32x32xi1>, vector<32x32xf32>
    %cst_30 = arith.constant dense<0xFF800000> : vector<32xf32>
    %66 = vector.multi_reduction <maximumf>, %65, %cst_30 [1] : vector<32x32xf32> to vector<32xf32>
    %67 = vector.shape_cast %66 : vector<32xf32> to vector<32x1xf32>
    %68 = vector.broadcast %67 : vector<32x1xf32> to vector<32x32xf32>
    %69 = arith.subf %65, %68 : vector<32x32xf32>
    %70 = math.exp %69 : vector<32x32xf32>
    %cst_31 = arith.constant dense<0.000000e+00> : vector<32xf32>
    %71 = vector.multi_reduction <add>, %70, %cst_31 [1] : vector<32x32xf32> to vector<32xf32>
    %72 = vector.shape_cast %71 : vector<32xf32> to vector<32x1xf32>
    %73 = vector.broadcast %72 : vector<32x1xf32> to vector<32x32xf32>
    %74 = arith.divf %70, %73 : vector<32x32xf32>
    %cst_32 = arith.constant 0.000000e+00 : f32
    %75 = vector.broadcast %cst_32 : f32 to vector<32x32xf32>
    %76 = arith.maximumf %13, %75 : vector<32x32xf32>
    %cst_33 = arith.constant dense<0.000000e+00> : vector<32x32xf32>
    %77 = tpu.matmul %74, %76, %cst_33 {dimension_numbers = #tpu.dot_dimension_numbers<[1], [0], [0], [1], [0, 0, 1, 1], [], []>} : vector<32x32xf32>, vector<32x32xf32>, vector<32x32xf32> -> vector<32x32xf32>
    %c0_34 = arith.constant 0 : index
    %c0_35 = arith.constant 0 : index
    %78 = vector.load %arg9[%c0_34, %c0_35] : memref<32x128xf32, #tpu.memory_space<vmem>>, vector<32x128xf32>
    %c0_36 = arith.constant 0 : index
    %c0_37 = arith.constant 0 : index
    %c0_38 = arith.constant 0 : index
    %79 = vector.load %arg6[%c0_36, %c0_37, %c0_38] : memref<1x32x128xf32, #tpu.memory_space<vmem>>, vector<1x32x128xf32>
    %80 = vector.shape_cast %79 : vector<1x32x128xf32> to vector<32x128xf32>
    %cst_39 = arith.constant dense<0.000000e+00> : vector<32x128xf32>
    %81 = tpu.matmul %77, %80, %cst_39 {dimension_numbers = #tpu.dot_dimension_numbers<[1], [0], [0], [1], [0, 0, 1, 1], [], []>} : vector<32x32xf32>, vector<32x128xf32>, vector<32x128xf32> -> vector<32x128xf32>
    %82 = arith.addf %78, %81 : vector<32x128xf32>
    %c0_40 = arith.constant 0 : index
    %c0_41 = arith.constant 0 : index
    %83 = vector.load %arg9[%c0_40, %c0_41] : memref<32x128xf32, #tpu.memory_space<vmem>>, vector<32x128xf32>
    tpu.vector_store %arg9[%c0_40, %c0_41], %82 {strides = array<i32>} : memref<32x128xf32, #tpu.memory_space<vmem>>, vector<32x128xf32>,
    %c3_i32 = arith.constant 3 : i32
    %84 = arith.cmpi eq, %arg1, %c3_i32 : i32
    %85 = arith.extui %84 : i1 to i32
    %c0_i32_42 = arith.constant 0 : i32
    %86 = arith.cmpi ne, %85, %c0_i32_42 : i32
    scf.if %86 {
      %c0_43 = arith.constant 0 : index
      %c0_44 = arith.constant 0 : index
      %87 = vector.load %arg9[%c0_43, %c0_44] : memref<32x128xf32, #tpu.memory_space<vmem>>, vector<32x128xf32>
      %c0_45 = arith.constant 0 : index
      %c0_46 = arith.constant 0 : index
      %88 = vector.load %arg7[%c0_45, %c0_46] : memref<1x128xf32, #tpu.memory_space<vmem>>, vector<1x128xf32>
      %89 = vector.broadcast %88 : vector<1x128xf32> to vector<32x128xf32>
      %90 = arith.addf %87, %89 : vector<32x128xf32>
      %c0_47 = arith.constant 0 : index
      %c0_48 = arith.constant 0 : index
      %c0_49 = arith.constant 0 : index
      %91 = vector.load %arg8[%c0_47, %c0_48, %c0_49] : memref<1x32x128xf32, #tpu.memory_space<vmem>>, vector<1x32x128xf32>
      %92 = vector.shape_cast %91 : vector<1x32x128xf32> to vector<32x128xf32>
      %93 = vector.shape_cast %90 : vector<32x128xf32> to vector<1x32x128xf32>
      tpu.vector_store %arg8[%c0_47, %c0_48, %c0_49], %93 {strides = array<i32>} : memref<1x32x128xf32, #tpu.memory_space<vmem>>, vector<1x32x128xf32>,
    } else {
    }
    return
  }
  func.func @transform_0(%arg0: i32, %arg1: i32) -> (i32, i32, i32) {
    %c0_i32 = arith.constant 0 : i32
    %c0_i32_0 = arith.constant 0 : i32
    %c0_i32_1 = arith.constant 0 : i32
    return %arg0, %c0_i32, %c0_i32_0 : i32, i32, i32
  }
  func.func @transform_1(%arg0: i32, %arg1: i32) -> (i32, i32, i32) {
    %c0_i32 = arith.constant 0 : i32
    %c0_i32_0 = arith.constant 0 : i32
    %c0_i32_1 = arith.constant 0 : i32
    return %arg1, %c0_i32, %c0_i32_0 : i32, i32, i32
  }
  func.func @transform_2(%arg0: i32, %arg1: i32) -> (i32, i32, i32) {
    %c0_i32 = arith.constant 0 : i32
    %c0_i32_0 = arith.constant 0 : i32
    %c0_i32_1 = arith.constant 0 : i32
    return %arg1, %c0_i32, %c0_i32_0 : i32, i32, i32
  }
  func.func @transform_3(%arg0: i32, %arg1: i32) -> (i32, i32, i32) {
    %c0_i32 = arith.constant 0 : i32
    %c0_i32_0 = arith.constant 0 : i32
    %c0_i32_1 = arith.constant 0 : i32
    return %arg1, %c0_i32, %c0_i32_0 : i32, i32, i32
  }
  func.func @transform_4(%arg0: i32, %arg1: i32) -> (i32, i32, i32) {
    %c0_i32 = arith.constant 0 : i32
    %c0_i32_0 = arith.constant 0 : i32
    %c0_i32_1 = arith.constant 0 : i32
    return %arg1, %c0_i32, %c0_i32_0 : i32, i32, i32
  }
  func.func @transform_5(%arg0: i32, %arg1: i32) -> (i32, i32) {
    %c0_i32 = arith.constant 0 : i32
    %c0_i32_0 = arith.constant 0 : i32
    %c0_i32_1 = arith.constant 0 : i32
    return %c0_i32, %c0_i32_0 : i32, i32
  }
  func.func @transform_6(%arg0: i32, %arg1: i32) -> (i32, i32, i32) {
    %c0_i32 = arith.constant 0 : i32
    %c0_i32_0 = arith.constant 0 : i32
    %c0_i32_1 = arith.constant 0 : i32
    return %arg0, %c0_i32, %c0_i32_0 : i32, i32, i32
  }
}

</mosaic_0001>

<bundles_post_ra>
// kernel: tpu_custom_call.1
= control target key start
LH: loop header
LB: loop body
LE: loop exit
PB: predicated region body
PF: predicated region fallthrough
CT: control target
= control target key end

     0   :  { %s2386_s0 = inlined_call_operand.vmem [shape: f32[2,32,128], index: 0, kind: input, shape index: {}]   ;;  %s2387_s1 = inlined_call_operand.vmem [shape: f32[4,128,32], index: 1, kind: input, shape index: {}]   ;;  %s2388_s2 = inlined_call_operand.vmem [shape: f32[4,128,32], index: 2, kind: input, shape index: {}]   ;;  %s2389_s3 = inlined_call_operand.vmem [shape: f32[4,128,32], index: 3, kind: input, shape index: {}]   ;;  %s2390_s4 = inlined_call_operand.vmem [shape: f32[4,32,128], index: 4, kind: input, shape index: {}]   ;;  %s2391_s5 = inlined_call_operand.vmem [shape: f32[1,128], index: 5, kind: input, shape index: {}]   ;;  %s2392_s6 = inlined_call_operand.hbm [shape: f32[2,32,128], index: 6, kind: output, shape index: {}]  }
   0x1   :  { %2398 = sst [smem:[#allocation12_spill]] %s2386_s0 }
   0x2   :  { %11 = vsyncpa [#allocation4], 0 }
   0x3   :  { %13 = vsyncpa [#allocation4 + $0x1], 0  ;;  %s1985_s21 = smov 0   ;;  %s1987_s22 = smov 0  }
   0x4   :  { %s1989_s23 = smov 0   ;;  %s1991_s24 = smov 0  }
   0x5   :  { %s1993_s25 = smov 0   ;;  %s1995_s26 = smov 0  }
   0x6   :  { %s1997_s27 = smov 0   ;;  %s1999_s28 = smov 0  }
   0x7 LB: > { %2399 = sst [smem:[#allocation6_spill]] %s1923_s23  ;;  %s1340_s29 = sadd.s32 4294967295, %s1943_s28   ;;  %s1943_s28 = sphi %s1999_s28, %s19_s28   ;;  %s1939_s27 = sphi %s1997_s27, %s2417_s27   ;;  %s1935_s26 = sphi %s1995_s26, %s2413_s26   ;;  %s1931_s25 = sphi %s1993_s25, %s2412_s25   ;;  %s1927_s24 = sphi %s1991_s24, %s2411_s24   ;;  %s1923_s23 = sphi %s1989_s23, %s2410_s23   ;;  %s1919_s22 = sphi %s1987_s22, %s2416_s22   ;;  %s1915_s21 = sphi %s1985_s21, %s2415_s21  }
   0x8   : > { %2400 = sst [smem:[#allocation7_spill]] %s1935_s26  ;;  %s1341_s30 = sadd.s32 4294967294, %s1943_s28  }
   0x9   : > { %2401 = sst [smem:[#allocation8_spill]] %s1939_s27  ;;  %s28_s7 = sadd.s32 1, %s1935_s26 }
   0xa   : > { %p29_p0 = scmp.ge.s32.totalorder %s28_s7, 4  ;;  %s31_s8 = sadd.s32 1, %s1939_s27 }
   0xb   : > { %p199_p1 = scmp.ne.s32.totalorder %s1923_s23, %s1919_s22  ;;  %p200_p2 = scmp.eq.s32.totalorder %s1340_s29, 7 }
   0xc   : > { %s2419_s7 = smov (%p29_p0, %s28_s7), 0  ;;  %s2421_s8 = smov (!%p29_p0, %s31_s8), %s1939_s27 }
   0xd   : > { %2402 = sst [smem:[#allocation9_spill]] %s2419_s7  ;;  %p2034_p3 = por %p200_p2, %p199_p1 }
   0xe   : > { %p205_p4 = scmp.ne.s32.totalorder %s1919_s22, %s1915_s21  ;;  %p33_p5 = scmp.ge.s32.totalorder %s2421_s8, 2 }
   0xf   : > { %p206_p6 = scmp.eq.s32.totalorder %s1341_s30, 7  ;;  %p1344_p7 = scmp.ge.s32.totalorder %s1943_s28, 1 }
  0x10   : > { %p267_p8 = scmp.lt.s32.totalorder %s1943_s28, 9  ;;  %s2423_s8 = smov (%p33_p5, %s2421_s8), 0 }
  0x11   : > { %2404 = sst [smem:[#allocation10_spill]] %s2423_s8  ;;  %p2044_p9 = por %p206_p6, %p205_p4 }
  0x12   : > { %p268_p10 = pnand %p1344_p7, %p267_p8  ;;  %s186_s11 = ssub.s32 %s1939_s27, %s2423_s8 }
  0x13   : > { %s189_s12 = sadd.s32 1, %s1923_s23  ;;  %p187_p11 = scmp.eq.s32.totalorder %s186_s11, 0 }
  0x14   : > { %271 = sbr.rel (%p268_p10) target bundleno = 1756 (0x6dc), region = 44  ;;  %s2396_s14 = sand.u32 (!%p268_p10), 1, %s1919_s22  }
  0x15   : > { %s2052_s13 = scalar_select %p187_p11, %s1923_s23, %s189_s12  }
  0x16   : > { %p317_p12 = scmp.lt.s32.totalorder (!%p268_p10), %s1931_s25, 1  ;;  %s1345_s15 = sshll.u32 (!%p268_p10), %s2396_s14, 5 }
  0x17   : > { %2406 = sst [smem:[#allocation11_spill]] %s2052_s13  ;;  %p322_p13 = scmp.lt.s32.totalorder (!%p268_p10), %s1927_s24, 3 }
  0x18   : > { %s2407_s0 = sld [smem:[#allocation12_spill]] (!%p268_p10)  ;;  %p1356_p0 = scmp.ne.s32.totalorder (!%p268_p10), %s1927_s24, 0 }
  0x1b   : > { %s318_s16 = scalar_select %p317_p12, %s1931_s25, 1 }
  0x1c   : > { %s323_s17 = scalar_select %p322_p13, %s1927_s24, 3 }
  0x1d   : > { %s1388_s18 = sshll.u32 %s318_s16, 5  ;;  %345 = sbr.rel (%p1356_p0) target bundleno = 36 (0x24), region = 48  ;;  %v1945_v0 = vmov (!%p1356_p0), 0.0  }
  0x1e   : > { %s2064_s29 = scalar_lea.vmem %s2407_s0, %s1388_s18  ;;  %s1389_s30 = sshll.u32 %s323_s17, 7  ;;  %346 = vst [vmem:[#allocation2] sm:$0xff] (!%p1356_p0), %v1945_v0  ;;  %347 = vst [vmem:[#allocation2 + $0x8] sm:$0xff] (!%p1356_p0), %v1945_v0 }
  0x1f   : > { %s2069_s8 = scalar_lea.vmem %s2387_s1, %s1389_s30  ;;  %s2074_s26 = scalar_lea.vmem %s2388_s2, %s1389_s30  ;;  %348 = vst [vmem:[#allocation2 + $0x10] sm:$0xff] (!%p1356_p0), %v1945_v0  ;;  %349 = vst [vmem:[#allocation2 + $0x18] sm:$0xff] (!%p1356_p0), %v1945_v0 }
  0x20   : > { %s2079_s16 = scalar_lea.vmem %s2389_s3, %s1389_s30  ;;  %s1392_s23 = sshll.u32 %s323_s17, 5 }
  0x21   : > { %s2084_s20 = scalar_lea.vmem %s2390_s4, %s1392_s23  ;;  %s2086_s0 = scalar_lea.vmem [#allocation3], %s1345_s15 }
  0x24 PF: > { %v455_v1 = vld [vmem:[%s2074_s26] sm:$0xff]  ;;  %v456_v2 = vld [vmem:[%s2074_s26 + $0x8] sm:$0xff]  ;;  %v457_v3 = vld [vmem:[%s2074_s26 + $0x10] sm:$0xff]  ;;  %vm657_vm0 = vcmask 261120   ;;  %p1381_p1 = scmp.ne.s32.totalorder %s1927_s24, 3 }
  0x25   : > { %v1666_v4 = vpack.c.bf16 %v456_v2, %v455_v1  ;;  %v458_v5 = vld [vmem:[%s2074_s26 + $0x18] sm:$0xff]  ;;  %v459_v7 = vld [vmem:[%s2074_s26 + $0x20] sm:$0xff]  ;;  %v460_v8 = vld [vmem:[%s2074_s26 + $0x28] sm:$0xff] }
  0x26   : > { %v1670_v6 = vpack.c.bf16 %v458_v5, %v457_v3  ;;  %v354_v9 = vld [vmem:[%s2069_s8] sm:$0xff]  ;;  %v355_v10 = vld [vmem:[%s2069_s8 + $0x8] sm:$0xff]  ;;  %v356_v12 = vld [vmem:[%s2069_s8 + $0x10] sm:$0xff]  ;;  %v1674_v14 = vpack.c.bf16 %v460_v8, %v459_v7 }
  0x27   : > { %1667 = vmatprep.subr.bf16.mxu1 %v1666_v4  ;;  %v1634_v11 = vpack.c.bf16 %v355_v10, %v354_v9  ;;  %v357_v13 = vld [vmem:[%s2069_s8 + $0x18] sm:$0xff]  ;;  %v358_v16 = vld [vmem:[%s2069_s8 + $0x20] sm:$0xff]  ;;  %v359_v17 = vld [vmem:[%s2069_s8 + $0x28] sm:$0xff] }
  0x28   : > { %1669 = vmatpush3.bf16.msra.mxu1 %v1666_v4  ;;  %v1638_v15 = vpack.c.bf16 %v357_v13, %v356_v12  ;;  %v461_v18 = vld [vmem:[%s2074_s26 + $0x30] sm:$0xff]  ;;  %v462_v19 = vld [vmem:[%s2074_s26 + $0x38] sm:$0xff]  ;;  %v1642_v20 = vpack.c.bf16 %v359_v17, %v358_v16  ;;  %v2104_v21 = vld [vmem:[%s2064_s29] sm:$0xff] }
  0x29   : > { %1671 = vmatprep.subr.bf16.mxu1 %v1670_v6  ;;  %1635 = vmatprep.subr.bf16.mxu0 %v1634_v11  ;;  %v1678_v22 = vpack.c.bf16 %v462_v19, %v461_v18  ;;  %v360_v23 = vld [vmem:[%s2069_s8 + $0x30] sm:$0xff]  ;;  %v361_v24 = vld [vmem:[%s2069_s8 + $0x38] sm:$0xff]  ;;  %v463_v25 = vld [vmem:[%s2074_s26 + $0x40] sm:$0xff] }
  0x2a   : > { %1637 = vmatpush3.bf16.msra.mxu0 %v1634_v11  ;;  %1548 = vmatprep.mubr.f32.mxu1 %v2104_v21  ;;  %v464_v26 = vld [vmem:[%s2074_s26 + $0x48] sm:$0xff]  ;;  %v1646_v27 = vpack.c.bf16 %v361_v24, %v360_v23  ;;  %v362_v29 = vld [vmem:[%s2069_s8 + $0x40] sm:$0xff]  ;;  %v465_v31 = vld [vmem:[%s2074_s26 + $0x50] sm:$0xff] }
  0x2b   : > { %1639 = vmatprep.subr.bf16.mxu0 %v1638_v15  ;;  %1510 = vmatprep.mubr.f32.mxu0 %v2104_v21  ;;  %v1682_v28 = vpack.c.bf16 %v464_v26, %v463_v25  ;;  %v363_v30 = vld [vmem:[%s2069_s8 + $0x48] sm:$0xff]  ;;  %v466_v32 = vld [vmem:[%s2074_s26 + $0x58] sm:$0xff]  ;;  %v364_v35 = vld [vmem:[%s2069_s8 + $0x50] sm:$0xff] }
  0x2c   : > { %1673 = vmatpush3.bf16.msra.mxu1 %v1670_v6  ;;  %v1650_v33 = vpack.c.bf16 %v363_v30, %v362_v29  ;;  %v1686_v34 = vpack.c.bf16 %v466_v32, %v465_v31  ;;  %v365_v36 = vld [vmem:[%s2069_s8 + $0x58] sm:$0xff]  ;;  %v467_v37 = vld [vmem:[%s2074_s26 + $0x60] sm:$0xff]  ;;  %v468_v38 = vld [vmem:[%s2074_s26 + $0x68] sm:$0xff] }
  0x2d   : > { %1675 = vmatprep.subr.bf16.mxu1 %v1674_v14  ;;  %v1654_v39 = vpack.c.bf16 %v365_v36, %v364_v35  ;;  %v1690_v40 = vpack.c.bf16 %v468_v38, %v467_v37  ;;  %v366_v41 = vld [vmem:[%s2069_s8 + $0x60] sm:$0xff]  ;;  %v367_v42 = vld [vmem:[%s2069_s8 + $0x68] sm:$0xff]  ;;  %v469_v43 = vld [vmem:[%s2074_s26 + $0x70] sm:$0xff] }
  0x2e   : > { %1641 = vmatpush3.bf16.msra.mxu0 %v1638_v15  ;;  %v470_v44 = vld [vmem:[%s2074_s26 + $0x78] sm:$0xff]  ;;  %v1658_v45 = vpack.c.bf16 %v367_v42, %v366_v41  ;;  %v368_v47 = vld [vmem:[%s2069_s8 + $0x70] sm:$0xff]  ;;  %v2127_v50 = vld [vmem:[%s2064_s29 + $0x8] sm:$0xff] }
  0x2f   : > { %1643 = vmatprep.subr.bf16.mxu0 %v1642_v20  ;;  %v1694_v46 = vpack.c.bf16 %v470_v44, %v469_v43  ;;  %v369_v48 = vld [vmem:[%s2069_s8 + $0x78] sm:$0xff]  ;;  %v2130_v51 = vld [vmem:[%s2064_s29 + $0x10] sm:$0xff]  ;;  %vm1731_vm1 = vmpackc.low %vm657_vm0, %vm657_vm0 }
  0x30   : > { %1677 = vmatpush3.bf16.msra.mxu1 %v1674_v14  ;;  %v1662_v49 = vpack.c.bf16 %v369_v48, %v368_v47  ;;  %v2135_v52 = vld [vmem:[%s2064_s29 + $0x18] sm:$0xff] }
  0x31   : > { %1679 = vmatprep.subr.bf16.mxu1 %v1678_v22 }
  0x32   : > { %1645 = vmatpush3.bf16.msra.mxu0 %v1642_v20  ;;  %v1946_v20 = vmov 0.0  }
  0x33   : > { %1647 = vmatprep.subr.bf16.mxu0 %v1646_v27 }
  0x34   : > { %1681 = vmatpush3.bf16.msra.mxu1 %v1678_v22 }
  0x35   : > { %1683 = vmatprep.subr.bf16.mxu1 %v1682_v28 }
  0x36   : > { %1649 = vmatpush3.bf16.msra.mxu0 %v1646_v27 }
  0x37   : > { %1651 = vmatprep.subr.bf16.mxu0 %v1650_v33 }
  0x38   : > { %1685 = vmatpush3.bf16.msra.mxu1 %v1682_v28 }
  0x39   : > { %1687 = vmatprep.subr.bf16.mxu1 %v1686_v34 }
  0x3a   : > { %1653 = vmatpush3.bf16.msra.mxu0 %v1650_v33 }
  0x3b   : > { %1655 = vmatprep.subr.bf16.mxu0 %v1654_v39 }
  0x3c   : > { %1689 = vmatpush3.bf16.msra.mxu1 %v1686_v34 }
  0x3d   : > { %1691 = vmatprep.subr.bf16.mxu1 %v1690_v40 }
  0x3e   : > { %1657 = vmatpush3.bf16.msra.mxu0 %v1654_v39 }
  0x3f   : > { %1659 = vmatprep.subr.bf16.mxu0 %v1658_v45 }
  0x40   : > { %1693 = vmatpush3.bf16.msra.mxu1 %v1690_v40 }
  0x41   : > { %1695 = vmatprep.subr.bf16.mxu1 %v1694_v46 }
  0x42   : > { %1661 = vmatpush3.bf16.msra.mxu0 %v1658_v45 }
  0x43   : > { %1663 = vmatprep.subr.bf16.mxu0 %v1662_v49 }
  0x44   : > { %1697 = vmatpush3.bf16.msra.mxu1 %v1694_v46 }
  0x46   : > { %1665 = vmatpush3.bf16.msra.mxu0 %v1662_v49 }
  0x47   : > { %1549 = vmatmul.mubr.f32.vlgmr.msra.gmra.mrb[0].mxu1 %v2127_v50 }
  0x48   : > { %1551 = vmatprep.mubr.f32.mxu1 %v2130_v51 }
  0x49   : > { %1511 = vmatmul.mubr.f32.vlgmr.msra.gmra.mrb[0].mxu0 %v2127_v50 }
  0x4a   : > { %1513 = vmatprep.mubr.f32.mxu0 %v2130_v51 }
  0x4b   : > { %1552 = vmatmul.mubr.f32.gmra.mrb[2].mxu1 %v2135_v52 }
  0x4d   : > { %1514 = vmatmul.mubr.f32.gmra.mrb[2].mxu0 %v2135_v52 }
  0x4e   : > { %1586 = vmatprep.mubr.f32.mxu0 %v2104_v21 }
 0x11a   : > { %v1550_v53 = vpop.f32.mrb[0].mxu1 }
 0x11b   : > { %v537_v54 = vpop.f32.mrb[1].mxu1 }
 0x11c   : > { %v1730_v55 = vpack.c.bf16 %v1550_v53, %v537_v54  ;;  %v1512_v56 = vpop.f32.mrb[0].mxu0 }
 0x11d   : > { %v436_v58 = vpop.f32.mrb[1].mxu0 }
 0x11e   : > { %1732 = vmatprep.subr.msk.bf16.mxu1 %vm1731_vm1, %v1730_v55  ;;  %v1553_v57 = vpop.f32.mrb[2].mxu1  ;;  %1600 = vmatprep.mubr.msk.f32.mxu1 %vm657_vm0, %v436_v58 }
 0x11f   : > { %1735 = vmatpush3.bf16.xpose.msk.msra.mxu1 %vm1731_vm1, %v1730_v55  ;;  %v547_v59 = vpop.f32.mrb[3].mxu1 }
 0x120   : > { %v1736_v60 = vpack.c.bf16 %v1553_v57, %v547_v59  ;;  %v1515_v61 = vpop.f32.mrb[2].mxu0 }
 0x121   : > { %v446_v62 = vpop.f32.mrb[3].mxu0 }
 0x122   : > { %1738 = vmatprep.subr.msk.bf16.mxu1 %vm1731_vm1, %v1736_v60 }
 0x127   : > { %1741 = vmatpush3.bf16.xpose.msk.msra.mxu1 %vm1731_vm1, %v1736_v60 }
 0x12e   : > { %1601 = vmatmul.mubr.msk.f32.vlgmr.msra.gmra.mrb[4].mxu1 %vm657_vm0, %v1512_v56 }
 0x12f   : > { %1603 = vmatprep.mubr.msk.f32.mxu1 %vm657_vm0, %v446_v62 }
 0x132   : > { %1604 = vmatmul.mubr.msk.f32.gmra.mrb[6].mxu1 %vm657_vm0, %v1515_v61 }
 0x201   : > { %v1602_v63 = vpop.f32.mrb[4].mxu1 }
 0x202   : > { %v2148_v0 = vmul.f32 0.088388346, %v1602_v63  ;;  %v748_v1 = vpop.f32.mrb[5].mxu1 }
 0x203   : > { %v2150_v2 = vmul.f32 0.088388346, %v748_v1 }
 0x204   : > { %vm772_vm3 = vcmp.lt.f32.partialorder %v2148_v0, 3.4028235e+38 }
 0x205   : > { %v1605_v3 = vpop.f32.mrb[6].mxu1  ;;  %vm771_vm2 = vcmp.lt.f32.partialorder %v2150_v2, 3.4028235e+38  ;;  %v776_v9 = vsel %vm772_vm3, %v2148_v0, -3.4028235e+38 }
 0x206   : > { %v2154_v4 = vmul.f32 0.088388346, %v1605_v3  ;;  %v758_v5 = vpop.f32.mrb[7].mxu1  ;;  %v775_v6 = vsel %vm771_vm2, %v2150_v2, -3.4028235e+38  ;;  %v782_v11 = vsel %vm657_vm0, %v776_v9, -inf }
 0x207   : > { %v2157_v7 = vmul.f32 0.088388346, %v758_v5  ;;  %v779_v8 = vsel %vm657_vm0, %v775_v6, -inf  ;;  %v556_v6 = vld [vmem:[%s2079_s16] sm:$0xff]  ;;  %v558_v9 = vld [vmem:[%s2079_s16 + $0x10] sm:$0xff] }
 0x208   : > { %780 = vmax.xlane.f32.xlu0 %v779_v8  ;;  %vm774_vm5 = vcmp.lt.f32.partialorder %v2154_v4, 3.4028235e+38  ;;  %v557_v8 = vld [vmem:[%s2079_s16 + $0x8] sm:$0xff] }
 0x209   : > { %vm773_vm4 = vcmp.lt.f32.partialorder %v2157_v7, 3.4028235e+38  ;;  %v778_v13 = vsel %vm774_vm5, %v2154_v4, -3.4028235e+38 }
 0x20a   : > { %v777_v10 = vsel %vm773_vm4, %v2157_v7, -3.4028235e+38  ;;  %v788_v14 = vsel %vm657_vm0, %v778_v13, -inf  ;;  %v560_v13 = vld [vmem:[%s2079_s16 + $0x20] sm:$0xff] }
 0x20b   : > { %v785_v12 = vsel %vm657_vm0, %v777_v10, -inf  ;;  %v1698_v10 = vpack.c.bf16 %v557_v8, %v556_v6 }
 0x20c   : > { %783 = vmax.xlane.f32.xlu0 %v782_v11  ;;  %786 = vmax.xlane.f32.xlu1 %v785_v12  ;;  %v559_v11 = vld [vmem:[%s2079_s16 + $0x18] sm:$0xff] }
 0x20d   : > { %v1702_v12 = vpack.c.bf16 %v559_v11, %v558_v9  ;;  %1699 = vmatprep.subr.bf16.mxu0 %v1698_v10 }
 0x20e   : > { %1701 = vmatpush3.bf16.msra.mxu0 %v1698_v10 }
 0x20f   : > { %1703 = vmatprep.subr.bf16.mxu0 %v1702_v12 }
 0x210   : > { %789 = vmax.xlane.f32.xlu1 %v788_v14  ;;  %v561_v14 = vld [vmem:[%s2079_s16 + $0x28] sm:$0xff] }
 0x212   : > { %1705 = vmatpush3.bf16.msra.mxu0 %v1702_v12 }
 0x295   : > { %v781_v15 = vpop.xlane.xlu0 %780 }
 0x296   : > { %vm828_vm6 = vcmp.lt.f32.partialorder %v2150_v2, %v781_v15  ;;  %vm791_vm7 = vcmp.eq.f32.partialorder %v2150_v2, %v781_v15 }
 0x297   : > { %v832_v16 = vsel %vm828_vm6, %v2150_v2, -3.4028235e+38  ;;  %v1365_v21 = vsel %vm791_vm7, 1.0, %v1946_v20 }
 0x298   : > { %v836_v17 = vsel %vm657_vm0, %v832_v16, -inf  ;;  %v803_v23 = vsel %vm657_vm0, %v1365_v21, 0.0  ;;  %v562_v16 = vld [vmem:[%s2079_s16 + $0x30] sm:$0xff] }
 0x299   : > { %837 = vmax.xlane.f32.xlu0 %v836_v17  ;;  %v784_v18 = vpop.xlane.xlu0 %783  ;;  %v787_v19 = vpop.xlane.xlu1 %786  ;;  %v563_v17 = vld [vmem:[%s2079_s16 + $0x38] sm:$0xff] }
 0x29a   : > { %vm829_vm8 = vcmp.lt.f32.partialorder %v2148_v0, %v784_v18  ;;  %vm792_vm9 = vcmp.eq.f32.partialorder %v2148_v0, %v784_v18  ;;  %vm830_vm10 = vcmp.lt.f32.partialorder %v2157_v7, %v787_v19  ;;  %vm793_vm11 = vcmp.eq.f32.partialorder %v2157_v7, %v787_v19 }
 0x29b   : > { %v833_v22 = vsel %vm829_vm8, %v2148_v0, -3.4028235e+38  ;;  %v1366_v26 = vsel %vm792_vm9, 1.0, %v1946_v20  ;;  %v834_v27 = vsel %vm830_vm10, %v2157_v7, -3.4028235e+38  ;;  %v1367_v30 = vsel %vm793_vm11, 1.0, %v1946_v20 }
 0x29c   : > { %v839_v24 = vsel %vm657_vm0, %v833_v22, -inf  ;;  %v806_v28 = vsel %vm657_vm0, %v1366_v26, 0.0  ;;  %v842_v29 = vsel %vm657_vm0, %v834_v27, -inf  ;;  %v809_v32 = vsel %vm657_vm0, %v1367_v30, 0.0  ;;  %v566_v22 = vld [vmem:[%s2079_s16 + $0x50] sm:$0xff]  ;;  %v569_v26 = vld [vmem:[%s2079_s16 + $0x68] sm:$0xff] }
 0x29d   : > { %804 = vadd.xlane.f32.xlu0 %v803_v23  ;;  %840 = vmax.xlane.f32.xlu1 %v839_v24  ;;  %v790_v25 = vpop.xlane.xlu1 %789  ;;  %v567_v23 = vld [vmem:[%s2079_s16 + $0x58] sm:$0xff] }
 0x29e   : > { %vm831_vm12 = vcmp.lt.f32.partialorder %v2154_v4, %v790_v25  ;;  %vm794_vm13 = vcmp.eq.f32.partialorder %v2154_v4, %v790_v25  ;;  %v1718_v24 = vpack.c.bf16 %v567_v23, %v566_v22 }
 0x29f   : > { %v835_v31 = vsel %vm831_vm12, %v2154_v4, -3.4028235e+38  ;;  %v1368_v34 = vsel %vm794_vm13, 1.0, %v1946_v20 }
 0x2a0   : > { %v845_v33 = vsel %vm657_vm0, %v835_v31, -inf  ;;  %v812_v35 = vsel %vm657_vm0, %v1368_v34, 0.0 }
 0x2a1   : > { %807 = vadd.xlane.f32.xlu1 %v806_v28  ;;  %843 = vmax.xlane.f32.xlu0 %v842_v29  ;;  %v570_v28 = vld [vmem:[%s2079_s16 + $0x70] sm:$0xff]  ;;  %v571_v29 = vld [vmem:[%s2079_s16 + $0x78] sm:$0xff] }
 0x2a2   : > { %v1726_v30 = vpack.c.bf16 %v571_v29, %v570_v28 }
 0x2a5   : > { %810 = vadd.xlane.f32.xlu0 %v809_v32  ;;  %846 = vmax.xlane.f32.xlu1 %v845_v33 }
 0x2a9   : > { %813 = vadd.xlane.f32.xlu1 %v812_v35 }
 0x326   : > { %v838_v36 = vpop.xlane.xlu0 %837 }
 0x327   : > { %vm848_vm14 = vcmp.eq.f32.partialorder %v2150_v2, %v838_v36 }
 0x328   : > { %v1369_v37 = vsel %vm848_vm14, 1.0, %v1946_v20 }
 0x329   : > { %v860_v38 = vsel %vm657_vm0, %v1369_v37, 0.0 }
 0x32a   : > { %v2195_v39 = vpop.xlane.xlu0 %804  ;;  %861 = vadd.xlane.f32.xlu0 %v860_v38  ;;  %v841_v40 = vpop.xlane.xlu1 %840 }
 0x32b   : > { %vm872_vm15 = vcmp.lt.f32.partialorder %v2195_v39, 3.0  ;;  %vm849_vm1 = vcmp.eq.f32.partialorder %v2148_v0, %v841_v40 }
 0x32c   : > { %v1370_v41 = vsel %vm849_vm1, 1.0, %v1946_v20  ;;  %v2202_v42 = vsel %vm872_vm15, %v838_v36, %v781_v15  ;;  %v1706_v15 = vpack.c.bf16 %v561_v14, %v560_v13 }
 0x32d   : > { %v863_v43 = vsel %vm657_vm0, %v1370_v41, 0.0  ;;  %vm888_vm2 = vcmp.lt.f32.partialorder %v2150_v2, %v2202_v42 }
 0x32e   : > { %v844_v44 = vpop.xlane.xlu0 %843  ;;  %864 = vadd.xlane.f32.xlu1 %v863_v43  ;;  %v2207_v45 = vpop.xlane.xlu1 %807  ;;  %v892_v46 = vsel %vm888_vm2, %v2150_v2, -3.4028235e+38  ;;  %1707 = vmatprep.subr.bf16.mxu0 %v1706_v15 }
 0x32f   : > { %vm873_vm3 = vcmp.lt.f32.partialorder %v2207_v45, 3.0  ;;  %v896_v48 = vsel %vm657_vm0, %v892_v46, -inf  ;;  %vm850_vm5 = vcmp.eq.f32.partialorder %v2157_v7, %v844_v44  ;;  %1709 = vmatpush3.bf16.msra.mxu0 %v1706_v15 }
 0x330   : > { %v2213_v47 = vsel %vm873_vm3, %v841_v40, %v784_v18  ;;  %v1371_v60 = vsel %vm850_vm5, 1.0, %v1946_v20  ;;  %v1710_v18 = vpack.c.bf16 %v563_v17, %v562_v16 }
 0x331   : > { %vm889_vm4 = vcmp.lt.f32.partialorder %v2148_v0, %v2213_v47  ;;  %v866_v62 = vsel %vm657_vm0, %v1371_v60, 0.0 }
 0x332   : > { %v2218_v49 = vpop.xlane.xlu0 %810  ;;  %897 = vmax.xlane.f32.xlu1 %v896_v48  ;;  %v847_v53 = vpop.xlane.xlu1 %846  ;;  %v893_v54 = vsel %vm889_vm4, %v2148_v0, -3.4028235e+38  ;;  %1711 = vmatprep.subr.bf16.mxu0 %v1710_v18 }
 0x333   : > { %vm874_vm6 = vcmp.lt.f32.partialorder %v2218_v49, 3.0  ;;  %vm851_vm7 = vcmp.eq.f32.partialorder %v2154_v4, %v847_v53  ;;  %v899_v57 = vsel %vm657_vm0, %v893_v54, -inf  ;;  %1713 = vmatpush3.bf16.msra.mxu0 %v1710_v18 }
 0x334   : > { %v1372_v55 = vsel %vm851_vm7, 1.0, %v1946_v20  ;;  %v2227_v56 = vsel %vm874_vm6, %v844_v44, %v787_v19  ;;  %v564_v19 = vld [vmem:[%s2079_s16 + $0x40] sm:$0xff]  ;;  %v565_v20 = vld [vmem:[%s2079_s16 + $0x48] sm:$0xff] }
 0x335   : > { %v869_v58 = vsel %vm657_vm0, %v1372_v55, 0.0  ;;  %vm890_vm9 = vcmp.lt.f32.partialorder %v2157_v7, %v2227_v56  ;;  %v1714_v21 = vpack.c.bf16 %v565_v20, %v564_v19 }
 0x336   : > { %900 = vmax.xlane.f32.xlu1 %v899_v57  ;;  %870 = vadd.xlane.f32.xlu0 %v869_v58  ;;  %v2231_v59 = vpop.xlane.xlu1 %813  ;;  %v894_v1 = vsel %vm890_vm9, %v2157_v7, -3.4028235e+38 }
 0x337   : > { %vm875_vm8 = vcmp.lt.f32.partialorder %v2231_v59, 3.0  ;;  %v902_v5 = vsel %vm657_vm0, %v894_v1, -inf  ;;  %1715 = vmatprep.subr.bf16.mxu0 %v1714_v21 }
 0x338   : > { %v2239_v61 = vsel %vm875_vm8, %v847_v53, %v790_v25  ;;  %v568_v25 = vld [vmem:[%s2079_s16 + $0x60] sm:$0xff]  ;;  %1717 = vmatpush3.bf16.msra.mxu0 %v1714_v21 }
 0x339   : > { %vm891_vm10 = vcmp.lt.f32.partialorder %v2154_v4, %v2239_v61  ;;  %1719 = vmatprep.subr.bf16.mxu0 %v1718_v24  ;;  %v1722_v27 = vpack.c.bf16 %v569_v26, %v568_v25  ;;  %v1073_v25 = vld [vmem:[%s2084_s20] sm:$0xff]  ;;  %v1074_v26 = vld [vmem:[%s2084_s20 + $0x8] sm:$0xff] }
 0x33a   : > { %867 = vadd.xlane.f32.xlu0 %v866_v62  ;;  %v895_v63 = vsel %vm891_vm10, %v2154_v4, -3.4028235e+38 }
 0x33b   : > { %v905_v3 = vsel %vm657_vm0, %v895_v63, -inf }
 0x33c   : > { %906 = vmax.xlane.f32.xlu1 %v905_v3  ;;  %1721 = vmatpush3.bf16.msra.mxu0 %v1718_v24 }
 0x33d   : > { %1723 = vmatprep.subr.bf16.mxu0 %v1722_v27 }
 0x33e   : > { %903 = vmax.xlane.f32.xlu0 %v902_v5 }
 0x340   : > { %1725 = vmatpush3.bf16.msra.mxu0 %v1722_v27  ;;  %v1750_v27 = vpack.c.bf16 %v1074_v26, %v1073_v25 }
 0x341   : > { %1727 = vmatprep.subr.bf16.mxu0 %v1726_v30 }
 0x344   : > { %1729 = vmatpush3.bf16.msra.mxu0 %v1726_v30 }
 0x347   : > { %1587 = vmatmul.mubr.f32.vlgmr.msra.gmra.mrb[4].mxu0 %v2127_v50 }
 0x348   : > { %1589 = vmatprep.mubr.f32.mxu0 %v2130_v51 }
 0x34b   : > { %1590 = vmatmul.mubr.f32.gmra.mrb[6].mxu0 %v2135_v52 }
 0x3b7   : > { %v862_v31 = vpop.xlane.xlu0 %861 }
 0x3b8   : > { %v880_v32 = vadd.f32 %v862_v31, %v2195_v39 }
 0x3ba   : > { %v884_v35 = vsel %vm872_vm15, %v880_v32, %v2195_v39 }
 0x3bb   : > { %v865_v33 = vpop.xlane.xlu1 %864  ;;  %vm908_vm11 = vcmp.lt.f32.partialorder %v884_v35, 3.0  ;;  %v1076_v35 = vld [vmem:[%s2084_s20 + $0x18] sm:$0xff] }
 0x3bc   : > { %v881_v34 = vadd.f32 %v865_v33, %v2207_v45 }
 0x3be   : > { %v885_v50 = vsel %vm873_vm3, %v881_v34, %v2207_v45  ;;  %v1075_v34 = vld [vmem:[%s2084_s20 + $0x10] sm:$0xff] }
 0x3bf   : > { %v898_v36 = vpop.xlane.xlu1 %897  ;;  %vm909_vm13 = vcmp.lt.f32.partialorder %v885_v50, 3.0  ;;  %v1754_v50 = vpack.c.bf16 %v1076_v35, %v1075_v34 }
 0x3c0   : > { %v912_v37 = vsel %vm908_vm11, %v898_v36, %v2202_v42 }
 0x3c1   : > { %vm916_vm12 = vcmp.ge.f32.partialorder %v2150_v2, %v912_v37 }
 0x3c2   : > { %v920_v51 = vsel %vm916_vm12, %v2150_v2, -3.4028235e+38 }
 0x3c3   : > { %v871_v52 = vpop.xlane.xlu0 %870  ;;  %v901_v38 = vpop.xlane.xlu1 %900  ;;  %v924_v40 = vsel %vm657_vm0, %v920_v51, -inf }
 0x3c4   : > { %v883_v41 = vadd.f32 %v871_v52, %v2231_v59  ;;  %v913_v39 = vsel %vm909_vm13, %v901_v38, %v2213_v47  ;;  %925 = vmax.xlane.f32.xlu0 %v924_v40 }
 0x3c5   : > { %vm917_vm14 = vcmp.ge.f32.partialorder %v2148_v0, %v913_v39 }
 0x3c6   : > { %v921_v42 = vsel %vm917_vm14, %v2148_v0, -3.4028235e+38  ;;  %v887_v43 = vsel %vm875_vm8, %v883_v41, %v2231_v59 }
 0x3c7   : > { %v868_v44 = vpop.xlane.xlu0 %867  ;;  %v927_v2 = vsel %vm657_vm0, %v921_v42, -inf  ;;  %vm911_vm15 = vcmp.lt.f32.partialorder %v887_v43, 3.0 }
 0x3c8   : > { %v882_v45 = vadd.f32 %v868_v44, %v2218_v49  ;;  %928 = vmax.xlane.f32.xlu1 %v927_v2  ;;  %v1070_v44 = vld [vmem:[#allocation2 + $0x8] sm:$0xff]  ;;  %v1069_v2 = vld [vmem:[#allocation2] sm:$0xff] }
 0x3c9   : > { %v907_v46 = vpop.xlane.xlu1 %906 }
 0x3ca   : > { %v915_v48 = vsel %vm911_vm15, %v907_v46, %v2239_v61  ;;  %v886_v47 = vsel %vm874_vm6, %v882_v45, %v2218_v49 }
 0x3cb   : > { %vm910_vm1 = vcmp.lt.f32.partialorder %v886_v47, 3.0  ;;  %v904_v0 = vpop.xlane.xlu0 %903  ;;  %vm919_vm2 = vcmp.ge.f32.partialorder %v2154_v4, %v915_v48 }
 0x3cc   : > { %v914_v53 = vsel %vm910_vm1, %v904_v0, %v2227_v56  ;;  %v923_v54 = vsel %vm919_vm2, %v2154_v4, -3.4028235e+38  ;;  %v1072_v0 = vld [vmem:[#allocation2 + $0x18] sm:$0xff] }
 0x3cd   : > { %v933_v55 = vsel %vm657_vm0, %v923_v54, -inf  ;;  %vm918_vm3 = vcmp.ge.f32.partialorder %v2157_v7, %v914_v53  ;;  %v1071_v53 = vld [vmem:[#allocation2 + $0x10] sm:$0xff] }
 0x3ce   : > { %934 = vmax.xlane.f32.xlu1 %v933_v55  ;;  %v922_v57 = vsel %vm918_vm3, %v2157_v7, -3.4028235e+38 }
 0x3cf   : > { %v930_v58 = vsel %vm657_vm0, %v922_v57, -inf }
 0x3d0   : > { %931 = vmax.xlane.f32.xlu0 %v930_v58 }
 0x41a   : > { %v1588_v15 = vpop.f32.mrb[4].mxu0 }
 0x41b   : > { %v638_v16 = vpop.f32.mrb[5].mxu0  ;;  %v969_v17 = vmax.f32 %v1588_v15, 0.0 }
 0x41c   : > { %v968_v18 = vmax.f32 %v638_v16, 0.0 }
 0x41e   : > { %v1742_v19 = vpack.c.bf16 %v969_v17, %v968_v18  ;;  %v1591_v20 = vpop.f32.mrb[6].mxu0 }
 0x41f   : > { %v648_v21 = vpop.f32.mrb[7].mxu0  ;;  %v971_v22 = vmax.f32 %v1591_v20, 0.0 }
 0x420   : > { %v970_v23 = vmax.f32 %v648_v21, 0.0  ;;  %1743 = vmatprep.subr.bf16.mxu1 %v1742_v19 }
 0x421   : > { %1745 = vmatpush3.bf16.msra.mxu1 %v1742_v19 }
 0x422   : > { %v1746_v24 = vpack.c.bf16 %v971_v22, %v970_v23 }
 0x424   : > { %1747 = vmatprep.subr.bf16.mxu1 %v1746_v24 }
 0x425   : > { %1749 = vmatpush3.bf16.msra.mxu1 %v1746_v24 }
 0x426   : > { %1751 = vmatprep.subr.bf16.mxu1 %v1750_v27 }
 0x451   : > { %v926_v59 = vpop.xlane.xlu0 %925 }
 0x452   : > { %v936_v49 = vsub.f32 %v920_v51, %v926_v59 }
 0x454   : > { %v940_v60 = vmul.f32 1.442695, %v936_v49  ;;  %v1382_v49 = vld [vmem:[%s2391_s5] ss:$0 sm:$0xff] (!%p1381_p1) }
 0x455   : > { %v929_v61 = vpop.xlane.xlu1 %928 }
 0x456   : > { %1833 = vpow2.f32 %v940_v60  ;;  %v937_v62 = vsub.f32 %v921_v42, %v929_v61 }
 0x458   : > { %v942_v63 = vmul.f32 1.442695, %v937_v62 }
 0x45a   : > { %1835 = vpow2.f32 %v942_v63 }
 0x45b   : > { %v935_v56 = vpop.xlane.xlu1 %934 }
 0x45c   : > { %v939_v4 = vsub.f32 %v923_v54, %v935_v56 }
 0x45d   : > { %v932_v1 = vpop.xlane.xlu0 %931 }
 0x45e   : > { %v946_v3 = vmul.f32 1.442695, %v939_v4  ;;  %v938_v5 = vsub.f32 %v922_v57, %v932_v1 }
 0x460   : > { %v1834_v6 = vpop.eup %1833  ;;  %1837 = vpow2.f32 %v946_v3  ;;  %v944_v8 = vmul.f32 1.442695, %v938_v5 }
 0x461   : > { %v948_v7 = vsel %vm657_vm0, %v1834_v6, 0.0 }
 0x462   : > { %1839 = vpow2.f32 %v944_v8  ;;  %949 = vadd.xlane.f32.xlu0 %v948_v7 }
 0x464   : > { %v1836_v9 = vpop.eup %1835 }
 0x465   : > { %v951_v10 = vsel %vm657_vm0, %v1836_v9, 0.0 }
 0x466   : > { %952 = vadd.xlane.f32.xlu1 %v951_v10 }
 0x46a   : > { %v1838_v11 = vpop.eup %1837 }
 0x46b   : > { %v957_v12 = vsel %vm657_vm0, %v1838_v11, 0.0 }
 0x46c   : > { %v1840_v13 = vpop.eup %1839  ;;  %958 = vadd.xlane.f32.xlu1 %v957_v12 }
 0x46d   : > { %v954_v14 = vsel %vm657_vm0, %v1840_v13, 0.0 }
 0x46e   : > { %955 = vadd.xlane.f32.xlu0 %v954_v14 }
 0x4ef   : > { %v950_v28 = vpop.xlane.xlu0 %949 }
 0x4f0   : > { %1841 = vrcp.f32 %v950_v28 }
 0x4f3   : > { %v953_v29 = vpop.xlane.xlu1 %952 }
 0x4f4   : > { %1843 = vrcp.f32 %v953_v29 }
 0x4f9   : > { %v959_v30 = vpop.xlane.xlu1 %958 }
 0x4fa   : > { %v1842_v31 = vpop.eup %1841  ;;  %1845 = vrcp.f32 %v959_v30 }
 0x4fb   : > { %v956_v32 = vpop.xlane.xlu0 %955  ;;  %v961_v33 = vmul.f32 %v1842_v31, %v1834_v6 }
 0x4fc   : > { %1847 = vrcp.f32 %v956_v32 }
 0x4fd   : > { %1614 = vmatprep.mubr.msk.f32.mxu1 %vm657_vm0, %v961_v33 }
 0x4fe   : > { %v1844_v36 = vpop.eup %1843 }
 0x4ff   : > { %v963_v37 = vmul.f32 %v1844_v36, %v1836_v9 }
 0x501   : > { %1615 = vmatmul.mubr.msk.f32.vlgmr.msra.gmra.mrb[8].mxu1 %vm657_vm0, %v963_v37 }
 0x502   : > { %1753 = vmatpush3.bf16.msra.mxu1 %v1750_v27 }
 0x503   : > { %1755 = vmatprep.subr.bf16.mxu1 %v1754_v50 }
 0x504   : > { %v1846_v51 = vpop.eup %1845 }
 0x505   : > { %v967_v40 = vmul.f32 %v1846_v51, %v1838_v11 }
 0x506   : > { %v1848_v52 = vpop.eup %1847  ;;  %1757 = vmatpush3.bf16.msra.mxu1 %v1754_v50 }
 0x507   : > { %v965_v38 = vmul.f32 %v1848_v52, %v1840_v13 }
 0x509   : > { %1617 = vmatprep.mubr.msk.f32.mxu1 %vm657_vm0, %v965_v38 }
 0x50a   : > { %1618 = vmatmul.mubr.msk.f32.gmra.mrb[10].mxu1 %vm657_vm0, %v967_v40 }
 0x5d4   : > { %v1616_v41 = vpop.f32.mrb[8].mxu1 }
 0x5d5   : > { %v1050_v39 = vpop.f32.mrb[9].mxu1 }
 0x5d6   : > { %1628 = vmatprep.mubr.msk.f32.mxu1 %vm657_vm0, %v1050_v39 }
 0x5d7   : > { %1629 = vmatmul.mubr.msk.f32.vlgmr.msra.gmra.mrb[12].mxu1 %vm657_vm0, %v1616_v41 }
 0x5dd   : > { %v1619_v42 = vpop.f32.mrb[10].mxu1 }
 0x5de   : > { %v1060_v43 = vpop.f32.mrb[11].mxu1 }
 0x5df   : > { %1631 = vmatprep.mubr.msk.f32.mxu1 %vm657_vm0, %v1060_v43 }
 0x5e0   : > { %1632 = vmatmul.mubr.msk.f32.gmra.mrb[14].mxu1 %vm657_vm0, %v1619_v42 }
 0x6aa   : > { %v1630_v45 = vpop.f32.mrb[12].mxu1 }
 0x6ab   : > { %v1175_v46 = vadd.f32 %v1630_v45, %v1070_v44  ;;  %v1155_v48 = vpop.f32.mrb[13].mxu1 }
 0x6ac   : > { %v1174_v47 = vadd.f32 %v1155_v48, %v1069_v2 }
 0x6ad   : > { %1179 = vst [vmem:[#allocation2 + $0x8] sm:$0xff] %v1175_v46 }
 0x6ae   : > { %1178 = vst [vmem:[#allocation2] sm:$0xff] %v1174_v47 }
 0x6b1   : > { %1185 = sbr.rel (%p1381_p1) target bundleno = 1730 (0x6c2), region = 52 }
 0x6b3   : > { %v1633_v54 = vpop.f32.mrb[14].mxu1 }
 0x6b4   : > { %v1177_v55 = vadd.f32 %v1633_v54, %v1072_v0  ;;  %v1165_v57 = vpop.f32.mrb[15].mxu1  ;;  %v1187_v60 = vld [vmem:[#allocation2 + $0x8] sm:$0xff] (!%p1381_p1) }
 0x6b5   : > { %v1176_v58 = vadd.f32 %v1165_v57, %v1071_v53  ;;  %v1186_v59 = vld [vmem:[#allocation2] sm:$0xff] (!%p1381_p1)  ;;  %v1198_v62 = vadd.f32 (!%p1381_p1), %v1382_v49, %v1187_v60 }
 0x6b6   : > { %1181 = vst [vmem:[#allocation2 + $0x18] sm:$0xff] %v1177_v55  ;;  %v1197_v61 = vadd.f32 (!%p1381_p1), %v1382_v49, %v1186_v59 }
 0x6b7   : > { %1180 = vst [vmem:[#allocation2 + $0x10] sm:$0xff] %v1176_v58  ;;  %1202 = vst [vmem:[%s2086_s0 + $0x8] sm:$0xff] (!%p1381_p1), %v1198_v62 }
 0x6b8   : > { %1201 = vst [vmem:[%s2086_s0] sm:$0xff] %v1197_v61 }
 0x6bd   : > { %v1189_v56 = vld [vmem:[#allocation2 + $0x18] sm:$0xff] }
 0x6be   : > { %v1188_v63 = vld [vmem:[#allocation2 + $0x10] sm:$0xff]  ;;  %v1200_v1 = vadd.f32 %v1382_v49, %v1189_v56 }
 0x6bf   : > { %v1199_v4 = vadd.f32 %v1382_v49, %v1188_v63 }
 0x6c0   : > { %1204 = vst [vmem:[%s2086_s0 + $0x18] sm:$0xff] %v1200_v1 }
 0x6c1   : > { %1203 = vst [vmem:[%s2086_s0 + $0x10] sm:$0xff] %v1199_v4 }
 0x6c2 PF: > { %s1393_s24 = sshll.u32 %s1931_s25, 9  ;;  %s1219_s13 = sshll.u32 %s2086_s0, 4  ;;  %s2330_s13 = int_to_ptr.vmem [resolvable:$true] %s1219_s13 }
 0x6c3   : > { %s2327_s8 = scalar_lea.hbm %s2392_s6, %s1393_s24  ;;  %s2408_s14 = sand.u32 1, %s1919_s22  }
 0x6c4   : > { %s2334_s15 = scalar_lea.sflag [#allocation4], %s2408_s14  ;;  %s1849_s17 = scalar_lea.vmem %s2330_s13, 512 }
 0x6c5   : > { %p1850_p2 = scmp.ne.s32.totalorder %s2330_s13, %s1849_s17  ;;  %s1947_s25 = smov [#allocation3]  }
 0x6c6   : > { %s1853_s29 = sshll.u32 %s1947_s25, 4  ;;  %s1854_s29 = int_to_ptr.vmem [resolvable:$false] %s1853_s29 }
 0x6c7   : > { %p1851_p4 = pnand %p1850_p2, %p2034_p3  ;;  %s1855_s30 = scalar_lea.vmem %s1854_s29, 1024 }
 0x6c8   : > { %p1856_p6 = scmp.lt.s32.totalorder %s2330_s13, %s1854_s29  ;;  %p1857_p7 = scmp.lt.s32.totalorder %s1855_s30, %s1849_s17 }
 0x6c9   : > { %p1852_p5 = pneg %p1851_p4 }
 0x6ca   : > { %p1858_p8 = por %p1857_p7, %p1856_p6 }
 0x6cc   : > { %p1859_p10 = pnand %p1858_p8, %p1852_p5 }
 0x6ce   : > { %1862 = shalt.err (!%p1859_p10)
}
 0x6cf   : > { %s1863_s0 = scalar_lea.hbm %s2327_s8, 512  ;;  %s1867_s16 = scalar_lea.hbm %s2392_s6, 1024 }
 0x6d0   : > { %p1864_p11 = scmp.ne.s32.totalorder %s2327_s8, %s1863_s0  ;;  %p1868_p0 = scmp.lt.u32.totalorder %s2327_s8, %s2392_s6 }
 0x6d1   : > { %p1869_p1 = scmp.lt.u32.totalorder %s1867_s16, %s1863_s0  ;;  %p1871_p4 = scmp.lt.u32.totalorder %s1863_s0, %s2327_s8 }
 0x6d2   : > { %p1865_p12 = pnand %p1864_p11, %p2034_p3 }
 0x6d3   : > { %p1870_p2 = por %p1869_p1, %p1868_p0 }
 0x6d4   : > { %p1866_p13 = pneg %p1865_p12 }
 0x6d5   : > { %p1872_p5 = por %p1871_p4, %p1870_p2 }
 0x6d7   : > { %p1873_p6 = pnand %p1872_p5, %p1866_p13 }
 0x6d9   : > { %1876 = shalt.err (!%p1873_p6)
}
 0x6da   : > { %s1948_s20 = smov 128   ;;  %s1949_s23 = smov 8  }
 0x6db   : > { %1758 = dma.vmem_to_hbm [thread:$0]  (%p2034_p3), %s2330_s13, 512, %s2327_s8, %s2334_s15, %s1948_s20, %s1948_s20, %s1949_s23  }
 0x6dc PF: > { %p1764_p7 = scmp.ge.s32.totalorder %s1943_s28, 2  ;;  %s1234_s26 = sand.u32 1, %s1915_s21  }
 0x6dd   : > { %s1235_s24 = scalar_lea.sflag [#allocation4], %s1234_s26 }
 0x6de   : > { %p1761_p8 = pnand %p1764_p7, %p2044_p9 }
 0x6e0   : > { %1910 = dma.done.wait (!%p1761_p8), %s1235_s24, 512  }
 0x6e1   : > { %1912 = vsyncadd (!%p1761_p8), %s1235_s24, 4294966784  ;;  %s19_s28 = sadd.s32 1, %s1943_s28   ;;  %s2409_s27 = sld [smem:[#allocation6_spill]] }
 0x6e2   : > { %p16_p10 = scmp.ge.s32.totalorder %s19_s28, 10   ;;  %s2410_s23 = sld [smem:[#allocation11_spill]] }
 0x6e3   : > { %s2411_s24 = sld [smem:[#allocation7_spill]]  ;;  %s2412_s25 = sld [smem:[#allocation8_spill]] }
 0x6e4   : > { %s2413_s26 = sld [smem:[#allocation9_spill]]  ;;  %s2414_s9 = sld [smem:[#allocation10_spill]] }
 0x6e5   : > { %s2415_s21 = smov %s1919_s22  ;;  %18 = sbr.rel (!%p16_p10) target bundleno = 7 (0x7), region = 99 }
 0x6e7   : > { %s2416_s22 = smov %s2409_s27 }
 0x6ea   : > { %s2417_s27 = smov %s2414_s9 }
 0x6ec   :  { %1240 = vsyncpa [#allocation4], 1 }
 0x6ed   :  { %1242 = vsyncpa [#allocation4 + $0x1], 1 }

</bundles_post_ra>
